<compile_context>
chip_gen: v7x
topology: tpu7x:2x2x1
jax: 0.10.0
libtpu: 0.0.40
codegen_flags: <defaults>
</compile_context>

<pallas_src>
import functools

import jax
import jax.numpy as jnp
from jax.experimental import pallas as pl
from jax.experimental.pallas import tpu as pltpu


# ------------------------------ tiling helpers -------------------------------

def _round_up(x, m):
    return ((x + m - 1) // m) * m


def _vmem_capacity_bytes():
    try:
        return int(pltpu.get_tpu_info().vmem_capacity_bytes)
    except Exception:
        return 64 * 2 ** 20  # conservative (v7x) default


def _plan_tiling(n, d, nb):
    """Generation-aware tiling plan for the propagation kernel."""
    d_pad = max(128, _round_up(d, 128))
    cap = _vmem_capacity_bytes()
    limit_cap = max(32 * 2 ** 20, cap - 16 * 2 ** 20)   # scoped-VMEM clamp w/ headroom
    budget = (cap * 5) // 8                             # target working set for tiles

    # node-row tile: keep M large for the MXU; tiny graphs collapse to a single tile.
    if n <= 256:
        tile_m = max(16, _round_up(n, 16))
    else:
        tile_m = 256
    n_pad = _round_up(n, tile_m)

    k_total = nb * n_pad                       # unified contraction length
    msg_bytes = k_total * d_pad * 2            # bf16 message table

    fixed = (2 * tile_m * d_pad * 2            # X tile (bf16, double-buffered)
             + 2 * d_pad * d_pad * 2           # root   (bf16)
             + 2 * d_pad * 4                   # bias   (f32)
             + 2 * tile_m * d_pad * 4          # output blocks (budgeted as f32)
             + tile_m * d_pad * 4)             # f32 accumulator scratch

    def working_set(tk, resident):
        ws = fixed + 2 * tile_m * tk * 2                          # A_cat row tile (bf16)
        ws += 2 * msg_bytes if resident else 2 * tk * d_pad * 2   # messages
        return ws

    min_tk = k_total if k_total <= 128 else 128
    msg_resident = working_set(min_tk, True) <= budget

    # largest contraction tile (multiple of 128, or the full K) that fits the budget
    tile_k = k_total
    if working_set(tile_k, msg_resident) > budget:
        tile_k = min_tk
        c = k_total // 128
        while c >= 1:
            tk = c * 128
            if k_total % tk == 0 and working_set(tk, msg_resident) <= budget:
                tile_k = tk
                break
            c -= 1

    vmem_limit = int(min(limit_cap,
                         max(32 * 2 ** 20, 2 * working_set(tile_k, msg_resident))))
    return dict(tile_m=tile_m, n_pad=n_pad, d_pad=d_pad, tile_k=tile_k,
                msg_resident=msg_resident, vmem_limit=vmem_limit)


# ----------------------------- Pallas kernels --------------------------------

def _message_kernel(x_ref, basis_ref, msg_ref):
    # msg_cat[b*N_pad + node_tile, :] = X_tile @ basis_b
    msg_ref[...] = jnp.dot(
        x_ref[...], basis_ref[...], preferred_element_type=jnp.float32
    ).astype(msg_ref.dtype)


def _compute_messages(x_bf, basis_bf, *, tile_m, vmem_limit):
    """x_bf: [N_pad, D_pad] bf16, basis_bf: [B, D_pad, D_pad] bf16
       -> msg_cat: [B*N_pad, D_pad] bf16 (basis-major row blocks)."""
    n_pad, d_pad = x_bf.shape
    nb = basis_bf.shape[0]
    n_tiles = n_pad // tile_m
    return pl.pallas_call(
        _message_kernel,
        out_shape=jax.ShapeDtypeStruct((nb * n_pad, d_pad), jnp.bfloat16),
        grid=(n_tiles, nb),
        in_specs=[
            pl.BlockSpec((tile_m, d_pad), lambda n, b: (n, 0)),                    # X tile
            pl.BlockSpec((pl.Squeezed(), d_pad, d_pad), lambda n, b: (b, 0, 0)),   # basis_b
        ],
        out_specs=pl.BlockSpec((tile_m, d_pad),
                               lambda n, b, nt=n_tiles: (b * nt + n, 0)),
        compiler_params=pltpu.CompilerParams(
            dimension_semantics=("parallel", "arbitrary"),
            vmem_limit_bytes=int(vmem_limit),
        ),
    )(x_bf, basis_bf)


def _propagate_kernel(a_ref, msg_ref, x_ref, root_ref, bias_ref, out_ref, acc_ref, *,
                      tile_k, slice_msg, apply_relu):
    """grid = (node row tiles [parallel], K tiles [arbitrary reduction]).
    acc_ref is an f32 VMEM scratch; out_ref is written once at the last K step."""
    k = pl.program_id(1)

    if slice_msg:
        # msg is VMEM-resident: slice the current K window out of the full table.
        off = pl.multiple_of(k * tile_k, tile_k)
        m_blk = msg_ref[pl.ds(off, tile_k), :]
    else:
        m_blk = msg_ref[...]

    partial = jnp.dot(a_ref[...], m_blk, preferred_element_type=jnp.float32)

    @pl.when(k == 0)
    def _():
        # fused prologue: root transform + bias + first partial in a single store
        acc_ref[...] = (
            jnp.dot(x_ref[...], root_ref[...], preferred_element_type=jnp.float32)
            + bias_ref[...] + partial
        )

    @pl.when(k > 0)
    def _():
        acc_ref[...] += partial

    @pl.when(k == pl.num_programs(1) - 1)
    def _():
        res = acc_ref[...]
        if apply_relu:
            res = jnp.maximum(res, 0.0)
        out_ref[...] = res.astype(out_ref.dtype)


def _propagate(a_cat, msg_cat, x_bf, root_bf, bias_f32, *, tile_m, tile_k,
               msg_resident, apply_relu, out_dtype, vmem_limit):
    n_pad, d_pad = x_bf.shape
    k_total = a_cat.shape[1]
    nk = k_total // tile_k

    if msg_resident:
        # constant index map -> single DMA for the whole message table
        msg_spec = pl.BlockSpec((k_total, d_pad), lambda m, k: (0, 0))
    else:
        msg_spec = pl.BlockSpec((tile_k, d_pad), lambda m, k: (k, 0))

    kernel = functools.partial(_propagate_kernel, tile_k=tile_k,
                               slice_msg=(msg_resident and nk > 1),
                               apply_relu=apply_relu)
    return pl.pallas_call(
        kernel,
        out_shape=jax.ShapeDtypeStruct((n_pad, d_pad), out_dtype),
        grid=(n_pad // tile_m, nk),
        in_specs=[
            pl.BlockSpec((tile_m, tile_k), lambda m, k: (m, k)),   # A_cat row tile (streamed)
            msg_spec,                                              # messages
            pl.BlockSpec((tile_m, d_pad), lambda m, k: (m, 0)),    # X tile
            pl.BlockSpec((d_pad, d_pad), lambda m, k: (0, 0)),     # root
            pl.BlockSpec((1, d_pad), lambda m, k: (0, 0)),         # bias
        ],
        out_specs=pl.BlockSpec((tile_m, d_pad), lambda m, k: (m, 0)),
        scratch_shapes=[pltpu.VMEM((tile_m, d_pad), jnp.float32)],
        compiler_params=pltpu.CompilerParams(
            dimension_semantics=("parallel", "arbitrary"),
            vmem_limit_bytes=int(vmem_limit),
        ),
    )(a_cat, msg_cat, x_bf, root_bf, bias_f32)


# ------------------------- adjacency (edge-list scatter) -----------------------

def _build_a_cat(edge_index, edge_type, comp, n_relations, n_nodes, n_pad):
    """Scatter-mean adjacency pre-contracted with the basis coefficients, laid out as
    A_cat[t, b*N_pad + s] = sum_r comp[r, b] * A_r[t, s], in bf16.
    The dense f32 [R, N_pad, N_pad] tensor is never materialized.
    TODO(synk): scatter-add build itself has no clean Pallas equivalent; kept in plain JAX."""
    nb = comp.shape[1]
    src, tgt = edge_index[0], edge_index[1]
    deg = jnp.zeros((n_relations, n_nodes), jnp.float32).at[edge_type, tgt].add(1.0)
    inv_deg = 1.0 / jnp.maximum(deg, 1.0)
    w = comp[edge_type] * inv_deg[edge_type, tgt][:, None]                  # [E, B]
    rows = jnp.broadcast_to(tgt[:, None], w.shape)                          # [E, B]
    cols = src[:, None] + jnp.arange(nb, dtype=src.dtype)[None, :] * n_pad  # [E, B]
    a_cat = jnp.zeros((n_pad, nb * n_pad), jnp.float32).at[rows, cols].add(w)
    return a_cat.astype(jnp.bfloat16)


# ------------------------------ RGCNConv layer --------------------------------

def rgcn_conv(x_pad, edge_index, edge_type, n_relations, n_nodes, conv_params, *,
              plan, d, apply_relu, out_dtype):
    """One RGCNConv (basis decomposition, per-relation scatter-mean aggregation,
    root transform + bias).  x_pad: [N_pad, D_pad] -> [N_pad, D_pad] (out_dtype)."""
    n_pad, d_pad = plan["n_pad"], plan["d_pad"]
    basis, root, bias = conv_params["basis"], conv_params["root"], conv_params["bias"]
    nb = basis.shape[0]

    # zero-pad parameters to the lane-dense feature width; streamed weights in bf16
    basis_p = (jnp.zeros((nb, d_pad, d_pad), jnp.float32)
               .at[:, :d, :d].set(basis).astype(jnp.bfloat16))
    root_p = jnp.zeros((d_pad, d_pad), jnp.float32).at[:d, :d].set(root).astype(jnp.bfloat16)
    bias_p = jnp.zeros((1, d_pad), jnp.float32).at[0, :d].set(bias)

    a_cat = _build_a_cat(edge_index, edge_type, conv_params["comp"],
                         n_relations, n_nodes, n_pad)

    x_bf = x_pad.astype(jnp.bfloat16)
    msg_cat = _compute_messages(x_bf, basis_p, tile_m=plan["tile_m"],
                                vmem_limit=plan["vmem_limit"])
    return _propagate(a_cat, msg_cat, x_bf, root_p, bias_p,
                      tile_m=plan["tile_m"], tile_k=plan["tile_k"],
                      msg_resident=plan["msg_resident"],
                      apply_relu=apply_relu, out_dtype=out_dtype,
                      vmem_limit=plan["vmem_limit"])


# ------------------------------- RGCN model -----------------------------------

def init_params(key, n_entities, n_relations, dim, num_bases):
    ks = jax.random.split(key, 10)

    def conv_params(k0, k1, k2, k3):
        return {
            "basis": jax.random.normal(k0, (num_bases, dim, dim), jnp.float32) * 0.1,
            "comp": jax.random.normal(k1, (n_relations, num_bases), jnp.float32) * 0.1,
            "root": jax.random.normal(k2, (dim, dim), jnp.float32) * 0.1,
            "bias": jax.random.normal(k3, (dim,), jnp.float32) * 0.01,
        }

    return {
        "entity_embed": jax.random.normal(ks[0], (n_entities, dim), jnp.float32),
        "relation_embed": jax.random.normal(ks[1], (n_relations, dim), jnp.float32),
        "conv1": conv_params(ks[2], ks[3], ks[4], ks[5]),
        "conv2": conv_params(ks[6], ks[7], ks[8], ks[9]),
    }


def build_adjacency(edge_index, edge_type, n_relations, n_nodes):
    # dense per-relation scatter-mean adjacency A[r, target, source] (reference/fallback only)
    counts = jnp.zeros((n_relations, n_nodes, n_nodes), jnp.float32)
    counts = counts.at[edge_type, edge_index[1], edge_index[0]].add(1.0)
    deg = counts.sum(axis=2, keepdims=True)
    return counts / jnp.maximum(deg, 1.0)


def rgcn_forward(params, x, edge_index, edge_type, triples=None, y=None, *, use_pallas=None):
    n_relations = params["relation_embed"].shape[0]
    node_state = params["entity_embed"][x]     # TODO(synk): embedding gather stays plain JAX
    n_nodes, dim = node_state.shape

    if use_pallas is None:
        # small-problem fallback (per perf review): tiny graphs are launch-overhead bound
        use_pallas = (n_nodes * dim) >= (1 << 14)

    if use_pallas:
        nb = params["conv1"]["basis"].shape[0]
        plan = _plan_tiling(n_nodes, dim, nb)
        h = (jnp.zeros((plan["n_pad"], plan["d_pad"]), jnp.float32)
             .at[:n_nodes, :dim].set(node_state))
        h = rgcn_conv(h, edge_index, edge_type, n_relations, n_nodes, params["conv1"],
                      plan=plan, d=dim, apply_relu=True, out_dtype=jnp.bfloat16)
        # TODO(synk): dropout is identity here (eval-mode semantics; no RNG mask applied)
        # NOTE: padded rows of h hold relu(bias) (not zero); they never leak into real rows
        # because A_cat's padded source columns are all-zero and the final slice drops them.
        h = rgcn_conv(h, edge_index, edge_type, n_relations, n_nodes, params["conv2"],
                      plan=plan, d=dim, apply_relu=False, out_dtype=jnp.float32)
        node_state = h[:n_nodes, :dim]
    else:
        adj = build_adjacency(edge_index, edge_type, n_relations, n_nodes)
        node_state = _rgcn_conv_ref(node_state, adj, params["conv1"], True)
        node_state = _rgcn_conv_ref(node_state, adj, params["conv2"], False)

    loss = None
    if triples is not None and y is not None:
        head_state = node_state[triples[0]]
        rel_embedding = params["relation_embed"][triples[1]]
        tail_state = node_state[triples[2]]
        # TODO(synk): DistMult + BCEWithLogits kept in plain JAX (step-overhead dominated
        # in Pallas and forces a non-lane-dense 1-D store).
        logits = jnp.sum(head_state * rel_embedding * tail_state, axis=-1)
        loss = jnp.mean(
            jnp.maximum(logits, 0.0) - logits * y + jnp.log1p(jnp.exp(-jnp.abs(logits)))
        )
    return node_state, loss


# ------------------------- pure-JAX reference (f32) ----------------------------

def _rgcn_conv_ref(x, adj, conv, apply_relu):
    w = jnp.einsum("rb,bio->rio", conv["comp"], conv["basis"])
    msg = jnp.einsum("ni,rio->rno", x, w)
    out = x @ conv["root"] + jnp.einsum("rtn,rno->to", adj, msg) + conv["bias"]
    return jnp.maximum(out, 0.0) if apply_relu else out


def _forward_ref(params, x, edge_index, edge_type, triples, y):
    n_relations = params["relation_embed"].shape[0]
    h = params["entity_embed"][x]
    adj = build_adjacency(edge_index, edge_type, n_relations, h.shape[0])
    h = _rgcn_conv_ref(h, adj, params["conv1"], True)
    h = _rgcn_conv_ref(h, adj, params["conv2"], False)
    head = h[triples[0]]
    rel = params["relation_embed"][triples[1]]
    tail = h[triples[2]]
    logits = jnp.sum(head * rel * tail, axis=-1)
    loss = jnp.mean(
        jnp.maximum(logits, 0.0) - logits * y + jnp.log1p(jnp.exp(-jnp.abs(logits)))
    )
    return h, loss


# ----------------------------------- main --------------------------------------

if __name__ == "__main__":
    N_ENTITIES = 16
    N_RELATIONS = 4
    DIM = 32
    NUM_BASES = 4
    N_EDGES = 40
    N_TRIPLES = 8

    key = jax.random.PRNGKey(0)
    k_params, k_src, k_dst, k_rel, k_trip, k_y = jax.random.split(key, 6)

    params = init_params(k_params, N_ENTITIES, N_RELATIONS, DIM, NUM_BASES)

    x = jnp.arange(N_ENTITIES, dtype=jnp.int32)
    edge_index = jnp.stack([
        jax.random.randint(k_src, (N_EDGES,), 0, N_ENTITIES),
        jax.random.randint(k_dst, (N_EDGES,), 0, N_ENTITIES),
    ]).astype(jnp.int32)
    edge_type = jax.random.randint(k_rel, (N_EDGES,), 0, N_RELATIONS).astype(jnp.int32)

    trip_nodes = jax.random.randint(k_trip, (2, N_TRIPLES), 0, N_ENTITIES)
    trip_rels = jax.random.randint(k_rel, (1, N_TRIPLES), 0, N_RELATIONS)
    triples = jnp.concatenate([trip_nodes[:1], trip_rels, trip_nodes[1:]],
                              axis=0).astype(jnp.int32)
    y = jax.random.bernoulli(k_y, 0.5, (N_TRIPLES,)).astype(jnp.float32)

    # force the Pallas path so the kernels are exercised even at this tiny size
    node_state, loss = rgcn_forward(params, x, edge_index, edge_type, triples, y,
                                    use_pallas=True)
    jax.block_until_ready(node_state)
    jax.block_until_ready(loss)

    assert node_state.shape == (N_ENTITIES, DIM)
    assert node_state.dtype == jnp.float32
    assert loss.shape == ()

    # validate against the pure-f32 JAX reference (bf16 streams -> relaxed tolerance)
    node_ref, loss_ref = _forward_ref(params, x, edge_index, edge_type, triples, y)
    assert bool(jnp.allclose(node_state, node_ref, atol=0.1, rtol=0.1)), "node_state mismatch"
    assert bool(jnp.allclose(loss, loss_ref, atol=0.1, rtol=0.1)), "loss mismatch"

    print("KERNEL_OK")
</pallas_src>

<mosaic_0001>
module attributes {stable_mosaic.version = 11 : i64} {
  func.func @_message_kernel(%arg0: i32, %arg1: i32, %arg2: memref<16x128xbf16, #tpu.memory_space<vmem>>, %arg3: memref<1x128x128xbf16, #tpu.memory_space<vmem>>, %arg4: memref<16x128xbf16, #tpu.memory_space<vmem>>) attributes {dimension_semantics = [#tpu.dimension_semantics<parallel>, #tpu.dimension_semantics<arbitrary>], iteration_bounds = array<i64: 1, 4>, scalar_prefetch = 0 : i64, scratch_operands = 0 : i64, tpu.core_type = #tpu.core_type<tc>, window_params = [{transform_indices = @transform_0, window_bounds = array<i64: 16, 128>}, {transform_indices = @transform_1, window_bounds = array<i64: 1, 128, 128>}, {transform_indices = @transform_2, window_bounds = array<i64: 16, 128>}]} {
    %c0 = arith.constant 0 : index
    %c0_0 = arith.constant 0 : index
    %0 = vector.load %arg2[%c0, %c0_0] : memref<16x128xbf16, #tpu.memory_space<vmem>>, vector<16x128xbf16>
    %c0_1 = arith.constant 0 : index
    %c0_2 = arith.constant 0 : index
    %c0_3 = arith.constant 0 : index
    %1 = vector.load %arg3[%c0_1, %c0_2, %c0_3] : memref<1x128x128xbf16, #tpu.memory_space<vmem>>, vector<1x128x128xbf16>
    %2 = vector.shape_cast %1 : vector<1x128x128xbf16> to vector<128x128xbf16>
    %cst = arith.constant dense<0.000000e+00> : vector<16x128xf32>
    %3 = tpu.matmul %0, %2, %cst {dimension_numbers = #tpu.dot_dimension_numbers<[1], [0], [0], [1], [0, 0, 1, 1], [], []>} : vector<16x128xbf16>, vector<128x128xbf16>, vector<16x128xf32> -> vector<16x128xf32>
    %4 = arith.truncf %3 : vector<16x128xf32> to vector<16x128xbf16>
    %c0_4 = arith.constant 0 : index
    %c0_5 = arith.constant 0 : index
    %5 = vector.load %arg4[%c0_4, %c0_5] : memref<16x128xbf16, #tpu.memory_space<vmem>>, vector<16x128xbf16>
    tpu.vector_store %arg4[%c0_4, %c0_5], %4 {strides = array<i32>} : memref<16x128xbf16, #tpu.memory_space<vmem>>, vector<16x128xbf16>,
    return
  }
  func.func @transform_0(%arg0: i32, %arg1: i32) -> (i32, i32) {
    %c0_i32 = arith.constant 0 : i32
    %c0_i32_0 = arith.constant 0 : i32
    return %arg0, %c0_i32 : i32, i32
  }
  func.func @transform_1(%arg0: i32, %arg1: i32) -> (i32, i32, i32) {
    %c0_i32 = arith.constant 0 : i32
    %c0_i32_0 = arith.constant 0 : i32
    %c0_i32_1 = arith.constant 0 : i32
    return %arg1, %c0_i32, %c0_i32_0 : i32, i32, i32
  }
  func.func @transform_2(%arg0: i32, %arg1: i32) -> (i32, i32) {
    %c1_i32 = arith.constant 1 : i32
    %0 = arith.muli %arg1, %c1_i32 : i32
    %1 = arith.addi %0, %arg0 : i32
    %c0_i32 = arith.constant 0 : i32
    %c0_i32_0 = arith.constant 0 : i32
    return %1, %c0_i32 : i32, i32
  }
}

</mosaic_0001>

<bundles_post_ra>
// kernel: tpu_custom_call.1
= control target key start
LH: loop header
LB: loop body
LE: loop exit
PB: predicated region body
PF: predicated region fallthrough
CT: control target
= control target key end

     0   :  { %7 = vsyncpa [#allocation3], 0  ;;  %s985_s0 = inlined_call_operand.hbm [shape: bf16[16,128], index: 0, kind: input, shape index: {}]   ;;  %s986_s1 = inlined_call_operand.hbm [shape: bf16[4,128,128], index: 1, kind: input, shape index: {}]   ;;  %s987_s2 = inlined_call_operand.hbm [shape: bf16[64,128], index: 2, kind: output, shape index: {}]  }
   0x1   :  { %8 = vsyncpa [#allocation6], 0 }
   0x2   :  { %10 = vsyncpa [#allocation6 + $0x1], 0 }
   0x3   :  { %11 = vsyncpa [#allocation4], 0 }
   0x4   :  { %13 = vsyncpa [#allocation4 + $0x1], 0  ;;  %s761_s9 = smov 0   ;;  %s763_s10 = smov 0  }
   0x5   :  { %s765_s11 = smov 0   ;;  %s767_s12 = smov 0  }
   0x6   :  { %s769_s13 = smov 0   ;;  %s771_s14 = smov 0  }
   0x7 LB: > { %s437_s15 = sadd.s32 4294967295, %s735_s14   ;;  %s438_s16 = sadd.s32 4294967294, %s735_s14   ;;  %s735_s14 = sphi %s771_s14, %s19_s14   ;;  %s731_s13 = sphi %s769_s13, %s1010_s13   ;;  %s727_s12 = sphi %s767_s12, %s1009_s12   ;;  %s723_s11 = sphi %s765_s11, %s1008_s11   ;;  %s719_s10 = sphi %s763_s10, %s1007_s10   ;;  %s715_s9 = sphi %s761_s9, %s1006_s9  }
   0x8   : > { %p77_p0 = scmp.ne.s32.totalorder %s719_s10, %s715_s9  ;;  %p795_p1 = scmp.eq.s32.totalorder %s437_s15, 0 }
   0x9   : > { %p799_p2 = scmp.eq.s32.totalorder %s437_s15, 3  ;;  %p109_p3 = scmp.eq.s32.totalorder %s438_s16, 3 }
   0xa   : > { %s992_s17 = scalar_select %p795_p1, 1, 0 }
   0xb   : > { %s993_s18 = scalar_select %p799_p2, 1, 0 }
   0xc   : > { %p805_p4 = por %p795_p1, %p77_p0  ;;  %p439_p5 = scmp.ge.s32.totalorder %s735_s14, 1 }
   0xd   : > { %p810_p6 = por %p109_p3, %p77_p0  ;;  %p116_p7 = scmp.lt.s32.totalorder %s735_s14, 5 }
   0xe   : > { %s994_s19 = scalar_select %p805_p4, 1, 0 }
   0xf   : > { %s995_s20 = scalar_select %p810_p6, 1, 0 }
  0x10   : > { %p815_p8 = pnand %p439_p5, %p116_p7  ;;  %s737_s22 = smov [#allocation2]  }
  0x11   : > { %s131_s23 = sshll.u32 %s737_s22, 4  ;;  %s28_s25 = sadd.s32 1, %s731_s13  ;;  %s132_s23 = int_to_ptr.vmem [resolvable:$true] %s131_s23 }
  0x12   : > { %s996_s21 = scalar_select %p815_p8, 1, 0 }
  0x13   : > { %p511_p9 = pneg %p815_p8  ;;  %s591_s28 = scalar_lea.hbm %s985_s0, 128 }
  0x14   : > { %p592_p11 = scmp.ne.s32.totalorder %s985_s0, %s591_s28  ;;  %p598_p3 = scmp.lt.u32.totalorder %s591_s28, %s985_s0 }
  0x15   : > { %p823_p10 = pnand %p511_p9, %p795_p1 }
  0x17   : > { %p593_p12 = pneg %p823_p10 }
  0x19   : > { %p594_p13 = pnand %p593_p12, %p592_p11 }
  0x1b   : > { %p595_p0 = pneg %p594_p13 }
  0x1d   : > { %p600_p5 = pnand %p598_p3, %p595_p0 }
  0x1f   : > { %603 = shalt.err (!%p600_p5)
}
  0x20   : > { %s604_s5 = scalar_lea.vmem %s132_s23, 128  ;;  %p612_p4 = scmp.lt.s32.totalorder %s132_s23, %s132_s23 }
  0x21   : > { %p605_p7 = scmp.ne.s32.totalorder %s132_s23, %s604_s5  ;;  %p613_p1 = scmp.lt.s32.totalorder %s604_s5, %s604_s5 }
  0x23   : > { %p607_p9 = pnand %p605_p7, %p593_p12  ;;  %p614_p8 = por %p613_p1, %p612_p4 }
  0x25   : > { %p608_p6 = pneg %p607_p9 }
  0x27   : > { %p615_p2 = pnand %p614_p8, %p608_p6 }
  0x29   : > { %618 = shalt.err (!%p615_p2)
}
  0x2a   : > { %s738_s6 = smov 64   ;;  %s739_s7 = smov 4  }
  0x2b   : > { %514 = dma.hbm_to_vmem [thread:$0]  (!%p823_p10), %s985_s0, 128, %s132_s23, [#allocation3], %s738_s6, %s738_s6, %s739_s7  }
  0x2c   : > { %p29_p1 = scmp.ge.s32.totalorder %s28_s25, 4  ;;  %s64_s16 = sadd.s32 1, %s723_s11 }
  0x2d   : > { %p71_p2 = scmp.ne.s32.totalorder %s723_s11, %s719_s10  ;;  %p72_p4 = scmp.eq.s32.totalorder %s735_s14, 0 }
  0x2e   : > { %s1012_s25 = smov (%p29_p1, %s28_s25), 0  ;;  %p999_p8 = scmp.ne.s32.totalorder %s993_s18, 0 }
  0x2f   : > { %p853_p6 = por %p72_p4, %p71_p2  ;;  %s61_s26 = ssub.s32 %s731_s13, %s1012_s25 }
  0x30   : > { %p859_p11 = por %p999_p8, %p71_p2  ;;  %p524_p12 = scmp.lt.s32.totalorder %s735_s14, 4 }
  0x31   : > { %p62_p10 = scmp.eq.s32.totalorder %s61_s26, 0  ;;  %s145_s23 = sand.u32 1, %s723_s11  }
  0x32   : > { %s442_s27 = sshll.u32 %s145_s23, 6  ;;  %s465_s29 = sshll.u32 %s731_s13, 10 }
  0x33   : > { %s868_s28 = scalar_select %p62_p10, %s723_s11, %s64_s16  }
  0x34   : > { %s874_s4 = scalar_lea.hbm %s986_s1, %s465_s29  ;;  %s149_s18 = scalar_lea.vmem [#allocation5], %s442_s27 }
  0x35   : > { %s156_s5 = sshll.u32 %s149_s18, 4  ;;  %p880_p13 = pnand %p524_p12, %p853_p6  ;;  %s876_s5 = int_to_ptr.vmem [resolvable:$true] %s156_s5 }
  0x36   : > { %s884_s15 = scalar_lea.sflag [#allocation6], %s145_s23  ;;  %s619_s16 = scalar_lea.hbm %s874_s4, 1024 }
  0x37   : > { %p620_p0 = scmp.ne.s32.totalorder %s874_s4, %s619_s16  ;;  %p621_p3 = pneg %p880_p13 }
  0x38   : > { %s624_s22 = scalar_lea.hbm %s986_s1, 4096  ;;  %p625_p9 = scmp.lt.u32.totalorder %s874_s4, %s986_s1 }
  0x39   : > { %p622_p5 = pnand %p621_p3, %p620_p0  ;;  %p626_p1 = scmp.lt.u32.totalorder %s624_s22, %s619_s16 }
  0x3a   : > { %p628_p4 = scmp.lt.u32.totalorder %s619_s16, %s874_s4 }
  0x3b   : > { %p623_p7 = pneg %p622_p5  ;;  %p627_p2 = por %p626_p1, %p625_p9 }
  0x3d   : > { %p629_p6 = por %p628_p4, %p627_p2 }
  0x3f   : > { %p630_p8 = pnand %p629_p6, %p623_p7 }
  0x41   : > { %633 = shalt.err (!%p630_p8)
}
  0x42   : > { %s634_s23 = scalar_lea.vmem %s876_s5, 1024  ;;  %s740_s3 = smov [#allocation5]  }
  0x43   : > { %p635_p12 = scmp.ne.s32.totalorder %s876_s5, %s634_s23  ;;  %s639_s18 = sshll.u32 %s740_s3, 4  ;;  %s640_s18 = int_to_ptr.vmem [resolvable:$false] %s639_s18 }
  0x44   : > { %s641_s26 = scalar_lea.vmem %s640_s18, 2048  ;;  %p642_p5 = scmp.lt.s32.totalorder %s876_s5, %s640_s18 }
  0x45   : > { %p637_p10 = pnand %p635_p12, %p621_p3  ;;  %p643_p9 = scmp.lt.s32.totalorder %s641_s26, %s634_s23 }
  0x47   : > { %p638_p0 = pneg %p637_p10  ;;  %p644_p1 = por %p643_p9, %p642_p5 }
  0x49   : > { %p645_p2 = pnand %p644_p1, %p638_p0 }
  0x4b   : > { %648 = shalt.err (!%p645_p2)
}
  0x4c   : > { %518 = dma.hbm_to_vmem [thread:$0]  (!%p880_p13), %s874_s4, 1024, %s876_s5, %s884_s15, %s738_s6, %s738_s6, %s739_s7  }
  0x4d   : > { %p1002_p3 = scmp.ne.s32.totalorder %s996_s21, 0 }
  0x4e   : > { %p1003_p7 = scmp.ne.s32.totalorder (!%p1002_p3), %s992_s17, 0 }
  0x4f   : > { %168 = sbr.rel (%p1002_p3) target bundleno = 355 (0x163), region = 28 }
  0x56   : > { %702 = dma.done.wait (%p1003_p7), [#allocation3], 128  }
  0x57   : > { %704 = vsyncadd (%p1003_p7), [#allocation3], 4294967168  ;;  %s922_s16 = sand.u32 1, %s719_s10   ;;  %p1004_p4 = scmp.ne.s32.totalorder %s994_s19, 0 }
  0x58   : > { %s447_s8 = sshll.u32 %s922_s16, 6  ;;  %s175_s27 = scalar_lea.sflag [#allocation6], %s922_s16 }
  0x59   : > { %s178_s22 = scalar_lea.vmem [#allocation5], %s447_s8 }
  0x5a   : > { %706 = dma.done.wait (%p1004_p4), %s175_s27, 1024  }
  0x5b   : > { %708 = vsyncadd (%p1004_p4), %s175_s27, 4294966272  ;;  %v741_v0 = vmov 0.0   ;;  %vm742_vm0 = vmmov 0   ;;  %v582_v1 = vld [vmem:[%s178_s22] sm:$0xff]   ;;  %v583_v2 = vld [vmem:[%s178_s22 + $0x8] sm:$0xff]   ;;  %s448_s17 = sshll.u32 %s922_s16, 3 }
  0x5c   : > { %483 = vmatprep.subr.bf16.mxu0 %v741_v0  ;;  %499 = vmatprep.mubr.msk.bf16.mxu0 %vm742_vm0, %v741_v0  ;;  %v584_v3 = vld [vmem:[%s178_s22 + $0x10] sm:$0xff]   ;;  %v585_v4 = vld [vmem:[%s178_s22 + $0x18] sm:$0xff]   ;;  %v586_v5 = vld [vmem:[%s178_s22 + $0x20] sm:$0xff]   ;;  %s198_s19 = scalar_lea.vmem [#allocation7], %s448_s17  ;;  %s468_s6 = sshll.u32 %s727_s12, 7 }
  0x5d   : > { %484 = vmatpush3.bf16.msra.mxu0 %v582_v1  ;;  %v587_v6 = vld [vmem:[%s178_s22 + $0x28] sm:$0xff]   ;;  %v588_v7 = vld [vmem:[%s178_s22 + $0x30] sm:$0xff]   ;;  %v589_v8 = vld [vmem:[%s178_s22 + $0x38] sm:$0xff]   ;;  %s341_s21 = sshll.u32 %s198_s19, 4  ;;  %s937_s5 = scalar_lea.hbm %s987_s2, %s468_s6  ;;  %s932_s21 = int_to_ptr.vmem [resolvable:$true] %s341_s21 }
  0x5e   : > { %485 = vmatprep.subr.bf16.mxu0 %v741_v0  ;;  %v590_v9 = vld [vmem:[#allocation2] sm:$0xff]   ;;  %s327_s15 = scalar_lea.sflag [#allocation4], %s922_s16  ;;  %s649_s29 = scalar_lea.vmem %s932_s21, 128 }
  0x5f   : > { %p650_p13 = scmp.ne.s32.totalorder %s932_s21, %s649_s29  ;;  %s743_s12 = smov [#allocation7]  }
  0x60   : > { %s653_s30 = sshll.u32 %s743_s12, 4  ;;  %s654_s30 = int_to_ptr.vmem [resolvable:$false] %s653_s30 }
  0x61   : > { %486 = vmatpush3.bf16.msra.mxu0 %v583_v2  ;;  %p651_p6 = pnand %p650_p13, %p859_p11  ;;  %s655_s23 = scalar_lea.vmem %s654_s30, 256 }
  0x62   : > { %487 = vmatprep.subr.bf16.mxu0 %v741_v0  ;;  %p656_p12 = scmp.lt.s32.totalorder %s932_s21, %s654_s30  ;;  %p657_p10 = scmp.lt.s32.totalorder %s655_s23, %s649_s29 }
  0x63   : > { %p652_p8 = pneg %p651_p6 }
  0x64   : > { %p658_p0 = por %p657_p10, %p656_p12 }
  0x65   : > { %488 = vmatpush3.bf16.msra.mxu0 %v584_v3 }
  0x66   : > { %489 = vmatprep.subr.bf16.mxu0 %v741_v0  ;;  %p659_p5 = pnand %p658_p0, %p652_p8 }
  0x69   : > { %490 = vmatpush3.bf16.msra.mxu0 %v585_v4 }
  0x6a   : > { %491 = vmatprep.subr.bf16.mxu0 %v741_v0 }
  0x6d   : > { %492 = vmatpush3.bf16.msra.mxu0 %v586_v5 }
  0x6e   : > { %493 = vmatprep.subr.bf16.mxu0 %v741_v0 }
  0x71   : > { %494 = vmatpush3.bf16.msra.mxu0 %v587_v6 }
  0x72   : > { %495 = vmatprep.subr.bf16.mxu0 %v741_v0 }
  0x75   : > { %496 = vmatpush3.bf16.msra.mxu0 %v588_v7 }
  0x76   : > { %497 = vmatprep.subr.bf16.mxu0 %v741_v0 }
  0x79   : > { %498 = vmatpush3.bf16.msra.mxu0 %v589_v8 }
  0x7c   : > { %500 = vmatmul.mubr.bf16.vlgmr.msra.gmra.mrb[0].mxu0 %v590_v9 }
 0x14f   : > { %v309_v10 = vpop.f32.mrb[0].mxu0 }
 0x150   : > { %v501_v11 = vpop.f32.mrb[1].mxu0 }
 0x151   : > { %v312_v12 = vpop.f32.mrb[2].mxu0 }
 0x152   : > { %v472_v13 = vpack.c.bf16 %v312_v12, %v309_v10  ;;  %v502_v14 = vpop.f32.mrb[3].mxu0 }
 0x154   : > { %473 = vst [vmem:[%s198_s19] sm:$0xff] %v472_v13  }
 0x155   : > { %662 = shalt.err (!%p659_p5)
}
 0x156   : > { %s663_s3 = scalar_lea.hbm %s937_s5, 128  ;;  %s667_s8 = scalar_lea.hbm %s987_s2, 512 }
 0x157   : > { %p664_p9 = scmp.ne.s32.totalorder %s937_s5, %s663_s3  ;;  %p668_p3 = scmp.lt.u32.totalorder %s937_s5, %s987_s2 }
 0x158   : > { %p669_p7 = scmp.lt.u32.totalorder %s667_s8, %s663_s3  ;;  %p671_p13 = scmp.lt.u32.totalorder %s663_s3, %s937_s5 }
 0x159   : > { %p665_p1 = pnand %p664_p9, %p859_p11 }
 0x15a   : > { %p670_p4 = por %p669_p7, %p668_p3 }
 0x15b   : > { %p666_p2 = pneg %p665_p1 }
 0x15c   : > { %p672_p6 = por %p671_p13, %p670_p4 }
 0x15e   : > { %p673_p8 = pnand %p672_p6, %p666_p2 }
 0x160   : > { %676 = shalt.err (!%p673_p8)
}
 0x161   : > { %s744_s17 = smov 64   ;;  %s745_s19 = smov 4  }
 0x162   : > { %509 = dma.vmem_to_hbm [thread:$0]  (%p859_p11), %s932_s21, 128, %s937_s5, %s327_s15, %s744_s17, %s744_s17, %s745_s19  }
 0x163 PF: > { %p526_p12 = scmp.ge.s32.totalorder %s735_s14, 2  ;;  %s356_s6 = sand.u32 1, %s715_s9  }
 0x164   : > { %p1005_p10 = scmp.ne.s32.totalorder %s995_s20, 0  ;;  %s357_s7 = scalar_lea.sflag [#allocation4], %s356_s6 }
 0x166   : > { %p520_p0 = pnand %p526_p12, %p1005_p10 }
 0x168   : > { %710 = dma.done.wait (!%p520_p0), %s357_s7, 128  }
 0x169   : > { %712 = vsyncadd (!%p520_p0), %s357_s7, 4294967168  ;;  %s19_s14 = sadd.s32 1, %s735_s14   ;;  %s1006_s9 = smov %s719_s10 }
 0x16a   : > { %p16_p5 = scmp.ge.s32.totalorder %s19_s14, 6   ;;  %s1007_s10 = smov %s723_s11 }
 0x16b   : > { %s1008_s11 = smov %s868_s28  ;;  %s1009_s12 = smov %s731_s13 }
 0x16c   : > { %s1010_s13 = smov %s1012_s25  ;;  %18 = sbr.rel (!%p16_p5) target bundleno = 7 (0x7), region = 79 }
 0x173   :  { %362 = vsyncpa [#allocation3], 1 }
 0x174   :  { %364 = vsyncpa [#allocation3 + $0x1], 1 }
 0x175   :  { %365 = vsyncpa [#allocation6], 1 }
 0x176   :  { %367 = vsyncpa [#allocation6 + $0x1], 1 }
 0x177   :  { %368 = vsyncpa [#allocation4], 1 }
 0x178   :  { %370 = vsyncpa [#allocation4 + $0x1], 1 }

</bundles_post_ra>
